<compile_context>
chip_gen: v7x
topology: tpu7x:2x2x1
jax: 0.10.0
libtpu: 0.0.40
codegen_flags: <defaults>
</compile_context>

<pallas_src>
import math
import functools
import numpy as np
import jax
import jax.numpy as jnp
from jax.experimental import pallas as pl
from jax.experimental.pallas import tpu as pltpu  # noqa: F401  (TPU-specific tuning hooks)


def circulant_mask_np(n: int, window: int) -> np.ndarray:
    """Same semantics as transforna.circulant_mask (band matrix of width `window`)."""
    if window >= n:
        return np.ones((n, n), dtype=np.float32)
    i = np.arange(n)[:, None]
    j = np.arange(n)[None, :]
    return (np.abs(i - j) <= window).astype(np.float32)


def _self_attention_kernel(
    x_ref,            # (B*T, H)  bf16   flattened activations
    bias_ref,         # (B, T, T) f32    fused pad bias + relative mask (-1e9) + learnable bias
    wq_ref, bq_ref,   # (H, P) bf16, (1, P) f32   (1/sqrt(P) already folded in)
    wk_ref, bk_ref,   # (H, P) bf16, (1, P) f32
    wv_ref, bv_ref,   # (H, P) bf16, (1, P) f32
    wo_ref, bo_ref,   # (P, H) bf16, (1, H) f32
    out_ref,          # (B*T, H)  f32
    attn_ref,         # (B, T, T) f32
):
    B, T, _ = attn_ref.shape
    x = x_ref[...]                                                     # (B*T, H) bf16

    # Q/K/V projections: one full-batch MXU matmul each (bf16 in, f32 accumulate).
    q = jnp.dot(x, wq_ref[...], preferred_element_type=jnp.float32) + bq_ref[...]
    k = jnp.dot(x, wk_ref[...], preferred_element_type=jnp.float32) + bk_ref[...]
    v = jnp.dot(x, wv_ref[...], preferred_element_type=jnp.float32) + bv_ref[...]

    P = q.shape[-1]
    qb = q.reshape(B, T, P).astype(jnp.bfloat16)
    kb = k.reshape(B, T, P).astype(jnp.bfloat16)
    vb = v.reshape(B, T, P).astype(jnp.bfloat16)

    # scores[b, i, j] = sum_d q[b, i, d] * k[b, j, d]  (contraction on last dims;
    # no explicit transpose -> K feeds the MXU directly)
    scores = jnp.einsum("bqd,bkd->bqk", qb, kb,
                        preferred_element_type=jnp.float32)            # (B, T, T) f32

    # single fused additive bias: pad mask + circulant(-1e9) + learnable rel-pos bias
    scores = scores + bias_ref[...]

    # softmax over keys, all in f32
    m = jnp.max(scores, axis=-1, keepdims=True)
    e = jnp.exp(scores - m)
    denom = jnp.sum(e, axis=-1, keepdims=True)
    probs = e * pl.reciprocal(denom, approx=True)                      # EUP reciprocal

    # attention-weighted values, then output projection (bf16 MXU operands, f32 acc)
    ctx = jnp.einsum("bqk,bkd->bqd", probs.astype(jnp.bfloat16), vb,
                     preferred_element_type=jnp.float32)               # (B, T, P)
    ctx = ctx.reshape(B * T, P).astype(jnp.bfloat16)

    out = jnp.dot(ctx, wo_ref[...], preferred_element_type=jnp.float32) + bo_ref[...]

    out_ref[...] = out
    attn_ref[...] = probs


@functools.partial(jax.jit, static_argnames=("n",))
def self_attention_pallas(attn_input, attention_mask, params, relative_mask_full, bias_vec, n):
    """attn_input: [B, T, H] f32, attention_mask: [B, T] f32 (1 keep, 0 pad)."""
    B, T, H = attn_input.shape
    P = params["wq"].shape[1]

    # ---- jitted JAX-side glue (tiny, fuses into the same XLA program) ----
    # learnable relative-position bias matrix B_matrix[i, j] = bias[n//2 - i + j]
    ii, jj = jnp.meshgrid(jnp.arange(T), jnp.arange(T), indexing="ij")
    bmat = bias_vec[n // 2 - ii + jj].astype(jnp.float32)               # (T, T)
    # circulant relative mask: masked positions -> -1e9 (torch uses -inf; exp underflows
    # to exactly 0 either way, and -1e9 avoids inf-arithmetic/NaN risk)
    rel = relative_mask_full[:T, :T]
    additive = jnp.where(rel == 0.0, jnp.float32(-1e9), bmat)           # (T, T)
    # per-query pad bias (broadcast over keys, as in the PyTorch module)
    ext = ((1.0 - attention_mask.astype(jnp.float32)) * -10000.0)[:, :, None]   # (B, T, 1)
    fused_bias = ext + additive[None, :, :]                             # (B, T, T)

    # Fold the 1/sqrt(P) score scale into the query projection (weights-only, O(H*P)).
    inv_sqrt_p = jnp.float32(1.0 / math.sqrt(P))
    wq = (params["wq"] * inv_sqrt_p).astype(jnp.bfloat16)
    bq = (params["bq"] * inv_sqrt_p).astype(jnp.float32)
    wk = params["wk"].astype(jnp.bfloat16)
    bk = params["bk"].astype(jnp.float32)
    wv = params["wv"].astype(jnp.bfloat16)
    bv = params["bv"].astype(jnp.float32)
    wo = params["wo"].astype(jnp.bfloat16)
    bo = params["bo"].astype(jnp.float32)

    # Flatten batch*seq so every projection is one lane-friendly matmul.
    x2 = attn_input.astype(jnp.bfloat16).reshape(B * T, H)

    # TODO(synk): for much larger B/T, add a batch-block grid axis (parallel, for v7x's
    # 2 TCs) and a key-tiled online-softmax loop instead of the full (T, T) scores.
    out2, attn = pl.pallas_call(
        _self_attention_kernel,
        out_shape=(
            jax.ShapeDtypeStruct((B * T, H), jnp.float32),
            jax.ShapeDtypeStruct((B, T, T), jnp.float32),
        ),
    )(x2, fused_bias, wq, bq, wk, bk, wv, bv, wo, bo)

    return out2.reshape(B, T, H), attn


def init_params(key, H, P, n):
    """Deterministic parameter init (shapes match the PyTorch module)."""
    keys = jax.random.split(key, 9)

    def lin(kw, kb, fan_in, fan_out):
        bound = 1.0 / math.sqrt(fan_in)
        w = jax.random.uniform(kw, (fan_in, fan_out), jnp.float32, -bound, bound)
        b = jax.random.uniform(kb, (1, fan_out), jnp.float32, -bound, bound)
        return w, b

    wq, bq = lin(keys[0], keys[1], H, P)
    wk, bk = lin(keys[2], keys[3], H, P)
    wv, bv = lin(keys[4], keys[5], H, P)
    wo, bo = lin(keys[6], keys[7], P, H)

    stdv = 1.0 / math.sqrt(n)
    bias_vec = jax.random.uniform(keys[8], (n,), jnp.float32, -stdv, stdv)

    params = dict(wq=wq, bq=bq, wk=wk, bk=bk, wv=wv, bv=bv, wo=wo, bo=bo)
    return params, bias_vec


if __name__ == "__main__":
    # small config consistent with the module's forward
    B, T = 2, 8                       # batch, sequence length
    H = 32                            # num_embed_hidden
    P = 16                            # num_attention_project
    n = 64                            # config.n (relative bias table length)
    tokens_len = 16                   # config.tokens_len (>= T)
    relative_attention = 3            # window

    key = jax.random.PRNGKey(0)
    k_x, k_p = jax.random.split(key)

    attn_input = jax.random.normal(k_x, (B, T, H), jnp.float32)
    # attention mask: batch 0 fully valid, batch 1 has last two positions padded
    attention_mask = jnp.ones((B, T), jnp.float32)
    attention_mask = attention_mask.at[1, T - 2:].set(0.0)

    params, bias_vec = init_params(k_p, H, P, n)
    relative_mask_full = jnp.asarray(circulant_mask_np(tokens_len, relative_attention))

    out, attn = self_attention_pallas(
        attn_input, attention_mask, params, relative_mask_full, bias_vec, n
    )
    jax.block_until_ready((out, attn))

    out_np = np.asarray(out)
    attn_np = np.asarray(attn)

    assert out_np.shape == (B, T, H)
    assert attn_np.shape == (B, T, T)
    assert np.all(np.isfinite(out_np))
    assert np.all(np.isfinite(attn_np))
    # softmax rows sum to ~1 (approx EUP reciprocal -> relaxed tolerance)
    assert np.allclose(attn_np.sum(axis=-1), 1.0, atol=5e-3)
    # positions outside the relative window must get (near-)zero attention
    rel_np = circulant_mask_np(tokens_len, relative_attention)[:T, :T]
    assert np.all(attn_np[:, rel_np == 0.0] < 1e-6)

    print("KERNEL_OK")
</pallas_src>

<mosaic_0001>
module attributes {stable_mosaic.version = 11 : i64} {
  func.func @_self_attention_kernel(%arg0: memref<16x32xbf16, #tpu.memory_space<vmem>>, %arg1: memref<2x8x8xf32, #tpu.memory_space<vmem>>, %arg2: memref<32x16xbf16, #tpu.memory_space<vmem>>, %arg3: memref<1x16xf32, #tpu.memory_space<vmem>>, %arg4: memref<32x16xbf16, #tpu.memory_space<vmem>>, %arg5: memref<1x16xf32, #tpu.memory_space<vmem>>, %arg6: memref<32x16xbf16, #tpu.memory_space<vmem>>, %arg7: memref<1x16xf32, #tpu.memory_space<vmem>>, %arg8: memref<16x32xbf16, #tpu.memory_space<vmem>>, %arg9: memref<1x32xf32, #tpu.memory_space<vmem>>, %arg10: memref<16x32xf32, #tpu.memory_space<vmem>>, %arg11: memref<2x8x8xf32, #tpu.memory_space<vmem>>) attributes {dimension_semantics = [], scalar_prefetch = 0 : i64, scratch_operands = 0 : i64, tpu.core_type = #tpu.core_type<tc>} {
    %c0 = arith.constant 0 : index
    %c0_0 = arith.constant 0 : index
    %0 = vector.load %arg0[%c0, %c0_0] : memref<16x32xbf16, #tpu.memory_space<vmem>>, vector<16x32xbf16>
    %c0_1 = arith.constant 0 : index
    %c0_2 = arith.constant 0 : index
    %1 = vector.load %arg2[%c0_1, %c0_2] : memref<32x16xbf16, #tpu.memory_space<vmem>>, vector<32x16xbf16>
    %cst = arith.constant dense<0.000000e+00> : vector<16x16xf32>
    %2 = tpu.matmul %0, %1, %cst {dimension_numbers = #tpu.dot_dimension_numbers<[1], [0], [0], [1], [0, 0, 1, 1], [], []>} : vector<16x32xbf16>, vector<32x16xbf16>, vector<16x16xf32> -> vector<16x16xf32>
    %c0_3 = arith.constant 0 : index
    %c0_4 = arith.constant 0 : index
    %3 = vector.load %arg3[%c0_3, %c0_4] : memref<1x16xf32, #tpu.memory_space<vmem>>, vector<1x16xf32>
    %4 = vector.broadcast %3 : vector<1x16xf32> to vector<16x16xf32>
    %5 = arith.addf %2, %4 : vector<16x16xf32>
    %c0_5 = arith.constant 0 : index
    %c0_6 = arith.constant 0 : index
    %6 = vector.load %arg4[%c0_5, %c0_6] : memref<32x16xbf16, #tpu.memory_space<vmem>>, vector<32x16xbf16>
    %cst_7 = arith.constant dense<0.000000e+00> : vector<16x16xf32>
    %7 = tpu.matmul %0, %6, %cst_7 {dimension_numbers = #tpu.dot_dimension_numbers<[1], [0], [0], [1], [0, 0, 1, 1], [], []>} : vector<16x32xbf16>, vector<32x16xbf16>, vector<16x16xf32> -> vector<16x16xf32>
    %c0_8 = arith.constant 0 : index
    %c0_9 = arith.constant 0 : index
    %8 = vector.load %arg5[%c0_8, %c0_9] : memref<1x16xf32, #tpu.memory_space<vmem>>, vector<1x16xf32>
    %9 = vector.broadcast %8 : vector<1x16xf32> to vector<16x16xf32>
    %10 = arith.addf %7, %9 : vector<16x16xf32>
    %c0_10 = arith.constant 0 : index
    %c0_11 = arith.constant 0 : index
    %11 = vector.load %arg6[%c0_10, %c0_11] : memref<32x16xbf16, #tpu.memory_space<vmem>>, vector<32x16xbf16>
    %cst_12 = arith.constant dense<0.000000e+00> : vector<16x16xf32>
    %12 = tpu.matmul %0, %11, %cst_12 {dimension_numbers = #tpu.dot_dimension_numbers<[1], [0], [0], [1], [0, 0, 1, 1], [], []>} : vector<16x32xbf16>, vector<32x16xbf16>, vector<16x16xf32> -> vector<16x16xf32>
    %c0_13 = arith.constant 0 : index
    %c0_14 = arith.constant 0 : index
    %13 = vector.load %arg7[%c0_13, %c0_14] : memref<1x16xf32, #tpu.memory_space<vmem>>, vector<1x16xf32>
    %14 = vector.broadcast %13 : vector<1x16xf32> to vector<16x16xf32>
    %15 = arith.addf %12, %14 : vector<16x16xf32>
    %16 = vector.shape_cast %5 : vector<16x16xf32> to vector<2x8x16xf32>
    %17 = arith.truncf %16 : vector<2x8x16xf32> to vector<2x8x16xbf16>
    %18 = vector.shape_cast %10 : vector<16x16xf32> to vector<2x8x16xf32>
    %19 = arith.truncf %18 : vector<2x8x16xf32> to vector<2x8x16xbf16>
    %20 = vector.shape_cast %15 : vector<16x16xf32> to vector<2x8x16xf32>
    %21 = arith.truncf %20 : vector<2x8x16xf32> to vector<2x8x16xbf16>
    "tpu.trace_start"() <{level = 10 : i32, message = "bqd,bkd->bqk"}> : () -> ()
    %cst_15 = arith.constant dense<0.000000e+00> : vector<2x8x8xf32>
    %22 = tpu.matmul %17, %19, %cst_15 {dimension_numbers = #tpu.dot_dimension_numbers<[2], [2], [1], [1], [0, 0, 0, 1, 1, 1], [0], [0]>} : vector<2x8x16xbf16>, vector<2x8x16xbf16>, vector<2x8x8xf32> -> vector<2x8x8xf32>
    "tpu.trace_stop"() : () -> ()
    %c0_16 = arith.constant 0 : index
    %c0_17 = arith.constant 0 : index
    %c0_18 = arith.constant 0 : index
    %23 = vector.load %arg1[%c0_16, %c0_17, %c0_18] : memref<2x8x8xf32, #tpu.memory_space<vmem>>, vector<2x8x8xf32>
    %24 = arith.addf %22, %23 : vector<2x8x8xf32>
    %cst_19 = arith.constant dense<0xFF800000> : vector<2x8xf32>
    %25 = vector.multi_reduction <maximumf>, %24, %cst_19 [2] : vector<2x8x8xf32> to vector<2x8xf32>
    %26 = vector.shape_cast %25 : vector<2x8xf32> to vector<2x8x1xf32>
    %27 = vector.broadcast %26 : vector<2x8x1xf32> to vector<2x8x8xf32>
    %28 = arith.subf %24, %27 : vector<2x8x8xf32>
    %29 = math.exp %28 : vector<2x8x8xf32>
    %cst_20 = arith.constant dense<0.000000e+00> : vector<2x8xf32>
    %30 = vector.multi_reduction <add>, %29, %cst_20 [2] : vector<2x8x8xf32> to vector<2x8xf32>
    %31 = vector.shape_cast %30 : vector<2x8xf32> to vector<2x8x1xf32>
    %32 = tpu.reciprocal %31 {approx = true} : vector<2x8x1xf32> -> vector<2x8x1xf32>
    %33 = vector.broadcast %32 : vector<2x8x1xf32> to vector<2x8x8xf32>
    %34 = arith.mulf %29, %33 : vector<2x8x8xf32>
    %35 = arith.truncf %34 : vector<2x8x8xf32> to vector<2x8x8xbf16>
    "tpu.trace_start"() <{level = 10 : i32, message = "bqk,bkd->bqd"}> : () -> ()
    %cst_21 = arith.constant dense<0.000000e+00> : vector<2x8x16xf32>
    %36 = tpu.matmul %35, %21, %cst_21 {dimension_numbers = #tpu.dot_dimension_numbers<[2], [1], [1], [2], [0, 0, 0, 1, 1, 2], [0], [0]>} : vector<2x8x8xbf16>, vector<2x8x16xbf16>, vector<2x8x16xf32> -> vector<2x8x16xf32>
    "tpu.trace_stop"() : () -> ()
    %37 = vector.shape_cast %36 : vector<2x8x16xf32> to vector<16x16xf32>
    %38 = arith.truncf %37 : vector<16x16xf32> to vector<16x16xbf16>
    %c0_22 = arith.constant 0 : index
    %c0_23 = arith.constant 0 : index
    %39 = vector.load %arg8[%c0_22, %c0_23] : memref<16x32xbf16, #tpu.memory_space<vmem>>, vector<16x32xbf16>
    %cst_24 = arith.constant dense<0.000000e+00> : vector<16x32xf32>
    %40 = tpu.matmul %38, %39, %cst_24 {dimension_numbers = #tpu.dot_dimension_numbers<[1], [0], [0], [1], [0, 0, 1, 1], [], []>} : vector<16x16xbf16>, vector<16x32xbf16>, vector<16x32xf32> -> vector<16x32xf32>
    %c0_25 = arith.constant 0 : index
    %c0_26 = arith.constant 0 : index
    %41 = vector.load %arg9[%c0_25, %c0_26] : memref<1x32xf32, #tpu.memory_space<vmem>>, vector<1x32xf32>
    %42 = vector.broadcast %41 : vector<1x32xf32> to vector<16x32xf32>
    %43 = arith.addf %40, %42 : vector<16x32xf32>
    %c0_27 = arith.constant 0 : index
    %c0_28 = arith.constant 0 : index
    %44 = vector.load %arg10[%c0_27, %c0_28] : memref<16x32xf32, #tpu.memory_space<vmem>>, vector<16x32xf32>
    tpu.vector_store %arg10[%c0_27, %c0_28], %43 {strides = array<i32>} : memref<16x32xf32, #tpu.memory_space<vmem>>, vector<16x32xf32>,
    %c0_29 = arith.constant 0 : index
    %c0_30 = arith.constant 0 : index
    %c0_31 = arith.constant 0 : index
    %45 = vector.load %arg11[%c0_29, %c0_30, %c0_31] : memref<2x8x8xf32, #tpu.memory_space<vmem>>, vector<2x8x8xf32>
    tpu.vector_store %arg11[%c0_29, %c0_30, %c0_31], %34 {strides = array<i32>} : memref<2x8x8xf32, #tpu.memory_space<vmem>>, vector<2x8x8xf32>,
    return
  }
}

</mosaic_0001>

<bundles_post_ra>
// kernel: self_attention_pallas.1
= control target key start
LH: loop header
LB: loop body
LE: loop exit
PB: predicated region body
PF: predicated region fallthrough
CT: control target
= control target key end

     0   :  { %17 = vsyncpa [#allocation3], 0  ;;  %v721_v1 = vmov 0.0   ;;  %vm722_vm0 = vmmov 0   ;;  %vm70_vm1 = vcmask 261120   ;;  %s904_s0 = inlined_call_operand.vmem [shape: bf16[16,32], index: 0, kind: input, shape index: {}]   ;;  %s905_s1 = inlined_call_operand.vmem [shape: f32[2,8,8], index: 1, kind: input, shape index: {}]   ;;  %s906_s2 = inlined_call_operand.vmem [shape: bf16[32,16], index: 2, kind: input, shape index: {}]   ;;  %s907_s3 = inlined_call_operand.vmem [shape: f32[1,16], index: 3, kind: input, shape index: {}]   ;;  %s908_s4 = inlined_call_operand.vmem [shape: bf16[32,16], index: 4, kind: input, shape index: {}]   ;;  %s909_s5 = inlined_call_operand.vmem [shape: f32[1,16], index: 5, kind: input, shape index: {}]   ;;  %s910_s6 = inlined_call_operand.vmem [shape: bf16[32,16], index: 6, kind: input, shape index: {}]   ;;  %s911_s7 = inlined_call_operand.vmem [shape: f32[1,16], index: 7, kind: input, shape index: {}]   ;;  %s912_s8 = inlined_call_operand.vmem [shape: bf16[16,32], index: 8, kind: input, shape index: {}]   ;;  %s913_s9 = inlined_call_operand.vmem [shape: f32[1,32], index: 9, kind: input, shape index: {}]   ;;  %s914_s10 = inlined_call_operand.hbm [shape: f32[16,32], index: 10, kind: output, shape index: {0}]   ;;  %s915_s11 = inlined_call_operand.hbm [shape: f32[2,8,8], index: 11, kind: output, shape index: {1}]  }
   0x1   :  { %v657_v0 = vld [vmem:[%s908_s4] sm:$0xff]   ;;  %605 = vmatprep.subr.bf16.mxu1 %v721_v1  ;;  %v658_v2 = vld [vmem:[%s908_s4 + $0x8] sm:$0xff]   ;;  %597 = vmatprep.subr.bf16.mxu0 %v721_v1 }
   0x2   :  { %606 = vmatpush3.bf16.msra.mxu1 %v657_v0  ;;  %v659_v3 = vld [vmem:[%s906_s2] sm:$0xff]   ;;  %609 = vmatprep.mubr.msk.bf16.mxu1 %vm722_vm0, %v721_v1  ;;  %v661_v4 = vld [vmem:[%s906_s2 + $0x8] sm:$0xff]  }
   0x3   :  { %607 = vmatprep.subr.bf16.mxu1 %v721_v1  ;;  %601 = vmatprep.mubr.msk.bf16.mxu0 %vm722_vm0, %v721_v1  ;;  %v660_v5 = vld [vmem:[%s904_s0] sm:$0xff]  }
   0x4   :  { %598 = vmatpush3.bf16.msra.mxu0 %v659_v3  ;;  %v662_v6 = vld [vmem:[%s910_s6] sm:$0xff]  }
   0x5   :  { %599 = vmatprep.subr.bf16.mxu0 %v721_v1 }
   0x6   :  { %608 = vmatpush3.bf16.msra.mxu1 %v658_v2 }
   0x7   :  { %621 = vmatprep.subr.bf16.mxu1 %v721_v1 }
   0x8   :  { %600 = vmatpush3.bf16.msra.mxu0 %v661_v4 }
   0x9   :  { %18 = vsyncpa [#allocation5], 0  ;;  %610 = vmatmul.mubr.msk.bf16.vlgmr.msra.gmra.mrb[0].mxu1 %vm70_vm1, %v660_v5  ;;  %613 = vmatprep.subr.bf16.mxu0 %v721_v1  ;;  %v663_v7 = vld [vmem:[%s910_s6 + $0x8] sm:$0xff]   ;;  %v563_v8 = vld [vmem:[%s909_s5] ss:$0 sm:$0xff]  ;;  %vm251_vm2 = vcmask 130048  }
   0xa   :  { %623 = vmatprep.mubr.msk.bf16.mxu1 %vm722_vm0, %v721_v1  ;;  %v558_v13 = vld [vmem:[%s907_s3] ss:$0 sm:$0xff]  ;;  %vm372_vm3 = vcmask 1043456   ;;  %v250_v41 = vld [vmem:[%s905_s1 + $0x8] sm:$0xff]  ;;  %vm344_vm4 = vcmask 64512   ;;  %s723_s16 = smov [#allocation4]  }
   0xb   :  { %602 = vmatmul.mubr.msk.bf16.vlgmr.msra.gmra.mrb[0].mxu0 %vm70_vm1, %v660_v5  ;;  %v567_v25 = vld [vmem:[%s911_s7] ss:$0 sm:$0xff]  ;;  %s543_s17 = sshll.u32 %s723_s16, 4  ;;  %s544_s17 = int_to_ptr.vmem [resolvable:$true] %s543_s17 }
   0xc   :  { %614 = vmatpush3.bf16.msra.mxu0 %v662_v6  ;;  %617 = vmatprep.mubr.msk.bf16.mxu0 %vm722_vm0, %v721_v1  ;;  %v249_v39 = vld [vmem:[%s905_s1] sm:$0xff]  ;;  %s673_s18 = scalar_lea.vmem %s544_s17, 256  ;;  %p678_p1 = scmp.lt.s32.totalorder %s544_s17, %s544_s17 }
   0xd   :  { %615 = vmatprep.subr.bf16.mxu0 %v721_v1  ;;  %p674_p0 = scmp.ne.s32.totalorder %s544_s17, %s673_s18  ;;  %p679_p2 = scmp.lt.s32.totalorder %s673_s18, %s673_s18 }
   0xf   :  { %p680_p3 = por %p679_p2, %p678_p1 }
  0x10   :  { %616 = vmatpush3.bf16.msra.mxu0 %v663_v7 }
  0x11   :  { %627 = vmatprep.subr.bf16.mxu0 %v721_v1  ;;  %p681_p4 = pnand %p680_p3, %p674_p0 }
  0x13   :  { %618 = vmatmul.mubr.msk.bf16.vlgmr.msra.gmra.mrb[4].mxu0 %vm70_vm1, %v660_v5 }
  0x14   :  { %629 = vmatprep.mubr.msk.bf16.mxu0 %vm722_vm0, %v721_v1 }
  0xdc   :  { %v172_v9 = vpop.f32.mrb[0].mxu1 }
  0xdd   :  { %v173_v10 = vadd.f32 %v563_v8, %v172_v9  ;;  %v611_v11 = vpop.f32.mrb[1].mxu1 }
  0xde   :  { %v175_v12 = vpop.f32.mrb[2].mxu1  ;;  %v108_v14 = vpop.f32.mrb[0].mxu0 }
  0xdf   :  { %v245_v15 = vpack.c.bf16 %v173_v10, %v173_v10  ;;  %v176_v16 = vadd.f32 %v563_v8, %v175_v12  ;;  %v612_v17 = vpop.f32.mrb[3].mxu1  ;;  %v603_v18 = vpop.f32.mrb[1].mxu0  ;;  %v109_v22 = vadd.f32 %v558_v13, %v108_v14  ;;  %v664_v8 = vld [vmem:[%s912_s8] sm:$0xff]  }
  0xe0   :  { %v111_v19 = vpop.f32.mrb[2].mxu0 }
  0xe1   :  { %v256_v20 = vsel %vm251_vm2, %v245_v15, 0  ;;  %v246_v21 = vpack.c.bf16 %v176_v16, %v176_v16  ;;  %v604_v23 = vpop.f32.mrb[3].mxu0  ;;  %v243_v26 = vpack.c.bf16 %v109_v22, %v109_v22  ;;  %v112_v27 = vadd.f32 %v558_v13, %v111_v19 }
  0xe2   :  { %622 = vmatpush3.bf16.xpose.msra.mxu1 %v256_v20 }
  0xe3   :  { %v302_v24 = vsel %vm251_vm2, %v246_v21, 0  ;;  %633 = vmatprep.subr.bf16.mxu1 %v721_v1  ;;  %v244_v32 = vpack.c.bf16 %v112_v27, %v112_v27 }
  0xe4   :  { %628 = vmatpush3.bf16.xpose.msra.mxu0 %v302_v24 }
  0xe5   :  { %639 = vmatprep.subr.bf16.mxu0 %v721_v1 }
  0xe6   :  { %v236_v28 = vpop.f32.mrb[4].mxu0 }
  0xe7   :  { %v237_v29 = vadd.f32 %v567_v25, %v236_v28  ;;  %v619_v30 = vpop.f32.mrb[5].mxu0 }
  0xe8   :  { %v239_v31 = vpop.f32.mrb[6].mxu0 }
  0xe9   :  { %624 = vmatmul.mubr.msk.bf16.vlgmr.msra.gmra.mrb[4].mxu1 %vm251_vm2, %v243_v26  ;;  %v247_v33 = vpack.c.bf16 %v237_v29, %v237_v29  ;;  %v240_v34 = vadd.f32 %v567_v25, %v239_v31  ;;  %v620_v35 = vpop.f32.mrb[7].mxu0 }
  0xea   :  { %635 = vmatprep.mubr.msk.bf16.mxu1 %vm722_vm0, %v721_v1 }
  0xeb   :  { %630 = vmatmul.mubr.msk.bf16.vlgmr.msra.gmra.mrb[8].mxu0 %vm251_vm2, %v244_v32  ;;  %v374_v36 = vsel %vm372_vm3, %v247_v33, 0  ;;  %v248_v37 = vpack.c.bf16 %v240_v34, %v240_v34 }
  0xec   :  { %634 = vmatpush3.bf16.msra.mxu1 %v374_v36  ;;  %641 = vmatprep.mubr.msk.bf16.mxu0 %vm722_vm0, %v721_v1 }
  0xed   :  { %v420_v38 = vsel %vm372_vm3, %v248_v37, 0  ;;  %645 = vmatprep.subr.bf16.mxu1 %v721_v1 }
  0xee   :  { %640 = vmatpush3.bf16.msra.mxu0 %v420_v38 }
 0x1bc   :  { %v292_v40 = vpop.f32.mrb[4].mxu1 }
 0x1bd   :  { %v293_v42 = vadd.f32 %v292_v40, %v249_v39  ;;  %v625_v43 = vpop.f32.mrb[5].mxu1 }
 0x1be   :  { %v295_v44 = vpop.f32.mrb[6].mxu1  ;;  %v338_v45 = vpop.f32.mrb[8].mxu0 }
 0x1bf   :  { %v339_v46 = vadd.f32 %v338_v45, %v250_v41  ;;  %v626_v47 = vpop.f32.mrb[7].mxu1  ;;  %v631_v48 = vpop.f32.mrb[9].mxu0  ;;  %v345_v49 = vsel %vm344_vm4, %v293_v42, -inf }
 0x1c0   :  { %346 = vmax.xlane.f32.xlu0 %v345_v49  ;;  %v341_v50 = vpop.f32.mrb[10].mxu0 }
 0x1c1   :  { %v632_v51 = vpop.f32.mrb[11].mxu0  ;;  %v348_v52 = vsel %vm344_vm4, %v339_v46, -inf }
 0x1c4   :  { %349 = vmax.xlane.f32.xlu0 %v348_v52 }
 0x24d   :  { %v347_v53 = vpop.xlane.xlu0 %346 }
 0x24e   :  { %v351_v54 = vsub.f32 %v293_v42, %v347_v53 }
 0x250   :  { %v353_v55 = vmul.f32 1.442695, %v351_v54 }
 0x251   :  { %v350_v56 = vpop.xlane.xlu0 %349 }
 0x252   :  { %665 = vpow2.f32 %v353_v55  ;;  %v352_v57 = vsub.f32 %v339_v46, %v350_v56 }
 0x254   :  { %v355_v58 = vmul.f32 1.442695, %v352_v57 }
 0x256   :  { %667 = vpow2.f32 %v355_v58 }
 0x25c   :  { %v666_v59 = vpop.eup %665 }
 0x25d   :  { %v357_v60 = vsel %vm344_vm4, %v666_v59, 0.0 }
 0x25e   :  { %358 = vadd.xlane.f32.xlu1 %v357_v60 }
 0x260   :  { %v668_v61 = vpop.eup %667 }
 0x261   :  { %v360_v62 = vsel %vm344_vm4, %v668_v61, 0.0 }
 0x262   :  { %361 = vadd.xlane.f32.xlu1 %v360_v62 }
 0x2eb   :  { %v359_v63 = vpop.xlane.xlu1 %358 }
 0x2ec   :  { %669 = vrcp.f32 %v359_v63 }
 0x2ef   :  { %v362_v0 = vpop.xlane.xlu1 %361 }
 0x2f0   :  { %671 = vrcp.f32 %v362_v0 }
 0x2f6   :  { %v670_v2 = vpop.eup %669 }
 0x2f7   :  { %v365_v3 = vmul.f32 %v670_v2, %v666_v59 }
 0x2f9   :  { %524 = vst.msk [vmem:[#allocation4] sm:$0xff] %vm344_vm4, %v365_v3  ;;  %v367_v4 = vpack.c.bf16 %v365_v3, %v365_v3 }
 0x2fa   :  { %v672_v5 = vpop.eup %671 }
 0x2fb   :  { %v366_v6 = vmul.f32 %v672_v5, %v668_v61  ;;  %636 = vmatmul.mubr.msk.bf16.vlgmr.msra.gmra.mrb[8].mxu1 %vm344_vm4, %v367_v4 }
 0x2fc   :  { %647 = vmatprep.mubr.msk.bf16.mxu1 %vm722_vm0, %v721_v1  ;;  %646 = vmatpush3.bf16.msra.mxu1 %v664_v8 }
 0x2fd   :  { %525 = vst.msk [vmem:[#allocation4 + $0x8] sm:$0xff] %vm344_vm4, %v366_v6  ;;  %v368_v7 = vpack.c.bf16 %v366_v6, %v366_v6 }
 0x2ff   :  { %642 = vmatmul.mubr.msk.bf16.vlgmr.msra.gmra.mrb[12].mxu0 %vm344_vm4, %v368_v7 }
 0x3ce   :  { %v410_v9 = vpop.f32.mrb[8].mxu1 }
 0x3cf   :  { %v637_v10 = vpop.f32.mrb[9].mxu1 }
 0x3d0   :  { %v413_v11 = vpop.f32.mrb[10].mxu1 }
 0x3d1   :  { %v638_v12 = vpop.f32.mrb[11].mxu1 }
 0x3d2   :  { %v456_v13 = vpop.f32.mrb[12].mxu0 }
 0x3d3   :  { %v462_v14 = vpack.c.bf16 %v456_v13, %v410_v9  ;;  %v643_v15 = vpop.f32.mrb[13].mxu0 }
 0x3d4   :  { %v459_v16 = vpop.f32.mrb[14].mxu0 }
 0x3d5   :  { %v644_v17 = vpop.f32.mrb[15].mxu0  ;;  %648 = vmatmul.mubr.msk.bf16.vlgmr.msra.gmra.mrb[12].mxu1 %vm251_vm2, %v462_v14 }
 0x3d6   :  { %684 = shalt.err (!%p681_p4)
}
 0x3d7   :  { %s685_s20 = scalar_lea.hbm %s915_s11, 256 }
 0x3d8   :  { %p686_p5 = scmp.ne.s32.totalorder %s915_s11, %s685_s20  ;;  %p689_p6 = scmp.lt.u32.totalorder %s685_s20, %s915_s11 }
 0x3da   :  { %p691_p7 = pnand %p689_p6, %p686_p5 }
 0x3dc   :  { %694 = shalt.err (!%p691_p7)
}
 0x3dd   :  { %s724_s4 = smov 128   ;;  %s725_s25 = smov 8   ;;  %v575_v1 = vld [vmem:[%s913_s9] ss:$0 sm:$0xff] }
 0x3de   :  { %549 = dma.vmem_to_hbm [thread:$0]  %s544_s17, 256, %s915_s11, [#allocation5], %s724_s4, %s724_s4, %s725_s25  }
 0x3df   :  { %s726_s28 = smov [#allocation2]  }
 0x3e0   :  { %s531_s29 = sshll.u32 %s726_s28, 4  ;;  %s532_s29 = int_to_ptr.vmem [resolvable:$true] %s531_s29 }
 0x3e1   :  { %s695_s6 = scalar_lea.vmem %s532_s29, 256  ;;  %p700_p9 = scmp.lt.s32.totalorder %s532_s29, %s532_s29 }
 0x3e2   :  { %p696_p8 = scmp.ne.s32.totalorder %s532_s29, %s695_s6  ;;  %p701_p10 = scmp.lt.s32.totalorder %s695_s6, %s695_s6 }
 0x3e4   :  { %p702_p11 = por %p701_p10, %p700_p9 }
 0x3e6   :  { %p703_p12 = pnand %p702_p11, %p696_p8 }
 0x4a8   :  { %v515_v18 = vpop.f32.mrb[12].mxu1 }
 0x4a9   :  { %v516_v19 = vadd.f32 %v575_v1, %v515_v18  ;;  %v649_v20 = vpop.f32.mrb[13].mxu1 }
 0x4aa   :  { %v518_v21 = vpop.f32.mrb[14].mxu1 }
 0x4ab   :  { %522 = vst.msk [vmem:[#allocation2] sm:$0xff] %vm70_vm1, %v516_v19  ;;  %v519_v22 = vadd.f32 %v575_v1, %v518_v21  ;;  %v650_v23 = vpop.f32.mrb[15].mxu1 }
 0x4ad   :  { %523 = vst.msk [vmem:[#allocation2 + $0x8] sm:$0xff] %vm70_vm1, %v519_v22 }
 0x4ae   :  { %706 = shalt.err (!%p703_p12)
}
 0x4af   :  { %s707_s30 = scalar_lea.hbm %s914_s10, 256 }
 0x4b0   :  { %p708_p13 = scmp.ne.s32.totalorder %s914_s10, %s707_s30  ;;  %p711_p0 = scmp.lt.u32.totalorder %s707_s30, %s914_s10 }
 0x4b2   :  { %p713_p1 = pnand %p711_p0, %p708_p13 }
 0x4b4   :  { %716 = shalt.err (!%p713_p1)
}
 0x4b5   :  { %537 = dma.vmem_to_hbm [thread:$0]  %s532_s29, 256, %s914_s10, [#allocation3], %s724_s4, %s724_s4, %s725_s25  }
 0x4b6   :  { %717 = dma.done.wait [#allocation3], 256  }
 0x4b7   :  { %718 = vsyncadd [#allocation3], 4294967040 }
 0x4b8   :  { %719 = dma.done.wait [#allocation5], 256  }
 0x4b9   :  { %720 = vsyncadd [#allocation5], 4294967040 }
 0x4ba   :  { %556 = vsyncpa [#allocation3], 1 }
 0x4bb   :  { %557 = vsyncpa [#allocation5], 1 }

</bundles_post_ra>
